<compile_context>
chip_gen: v5e
topology: v5e:2x2
jax: 0.10.0
libtpu: 0.0.40
codegen_flags: <defaults>
</compile_context>

<pallas_src>
from functools import partial

import jax
import jax.numpy as jnp
from jax import lax
from jax.experimental import pallas as pl
from jax.experimental.pallas import tpu as pltpu

# (padded-input offset d, kernel tap k) pairs of ConvTranspose2d(k=4, s=2, p=1),
# per spatial axis: phase 0 = even outputs, phase 1 = odd outputs.
_TAPS = {0: ((0, 3), (1, 1)), 1: ((1, 2), (2, 0))}


def _upsample2x_kernel(xcol_ref, w_ref, g_ref, b_ref, out_ref, *, eps, cout, total):
    # xcol_ref: (9*Cin, N*H*W)   im2col of the zero-padded input, spatial on lanes
    # w_ref   : (4*Cout, 9*Cin)  ConvTranspose weight scattered per (phase, offset) block
    # g_ref   : (Cout, 1)        BatchNorm gamma
    # b_ref   : (Cout, 1)        BatchNorm beta
    # out_ref : (4*Cout, N*H*W)  BN(ReLU(convT)) output, phase-major rows, lane-dense cols

    # One big matmul on the MXU: (4*Cout, 9*Cin) x (9*Cin, N*H*W), f32 accumulation.
    y = jnp.dot(w_ref[...], xcol_ref[...], preferred_element_type=jnp.float32)
    y = jnp.maximum(y, 0.0)                                     # ReLU

    # Per-channel batch statistics: cross-lane reduce over the spatial axis (XLU), then fold
    # the 4 phase blocks (row p*Cout + c) into per-channel sums with 3 tiny adds.
    rs = jnp.sum(y, axis=1, keepdims=True)                      # (4*Cout, 1)
    rss = jnp.sum(y * y, axis=1, keepdims=True)                 # (4*Cout, 1)
    cs = rs[0:cout] + rs[cout:2 * cout] + rs[2 * cout:3 * cout] + rs[3 * cout:4 * cout]
    css = rss[0:cout] + rss[cout:2 * cout] + rss[2 * cout:3 * cout] + rss[3 * cout:4 * cout]

    inv_total = 1.0 / total
    mean = cs * inv_total                                       # (Cout, 1)
    var = jnp.maximum(css * inv_total - mean * mean, 0.0)       # clamp rounding negatives
    inv = lax.rsqrt(var + eps)                                  # EUP
    scale = g_ref[...] * inv                                    # (Cout, 1)
    shift = b_ref[...] - mean * scale                           # (Cout, 1)

    # Broadcast scale/shift across the 4 phase row-blocks and fuse the normalization into
    # ONE full-tile, unmasked store (rows = 4*Cout multiple of 8, lanes = N*H*W mult. of 128).
    scale4 = jnp.concatenate([scale, scale, scale, scale], axis=0)   # (4*Cout, 1)
    shift4 = jnp.concatenate([shift, shift, shift, shift], axis=0)   # (4*Cout, 1)
    out_ref[...] = y * scale4 + shift4

    # TODO(synk): BatchNorm's running_mean/running_var update is a training-time side effect
    # with no influence on the forward output; it is not modeled here.


def upsample_2x_pallas(x_nchw, weight, gamma, beta, eps=1e-5):
    """x_nchw: (N, Cin, H, W); weight: (Cin, Cout, 4, 4) [PyTorch ConvTranspose2d layout]."""
    N, Cin, H, W = x_nchw.shape
    Cout = weight.shape[1]
    nhw = N * H * W

    x = x_nchw.astype(jnp.float32)
    xp = jnp.pad(x, ((0, 0), (0, 0), (1, 1), (1, 1)))            # (N, Cin, H+2, W+2)

    # im2col with (offset, cin) on rows and (n, h, w) on lanes: (9*Cin, N*H*W).
    cols = []
    for dh in range(3):
        for dw in range(3):
            s = xp[:, :, dh:dh + H, dw:dw + W]                   # (N, Cin, H, W)
            cols.append(jnp.transpose(s, (1, 0, 2, 3)).reshape(Cin, nhw))
    xcol = jnp.concatenate(cols, axis=0)                         # (9*Cin, N*H*W)

    # Scatter the ConvTranspose2d weight into (4*Cout, 9*Cin): block (phase p, offset o)
    # holds weight[:, :, kh, kw]^T when offset o=(dh,dw) feeds phase p=(ph,pw), else zeros.
    w = weight.astype(jnp.float32)
    wmat = jnp.zeros((4 * Cout, 9 * Cin), jnp.float32)
    for ph in range(2):
        for pw in range(2):
            p = ph * 2 + pw
            for dh, kh in _TAPS[ph]:
                for dw, kw in _TAPS[pw]:
                    o = dh * 3 + dw
                    wmat = wmat.at[p * Cout:(p + 1) * Cout,
                                   o * Cin:(o + 1) * Cin].set(w[:, :, kh, kw].T)

    g = gamma.reshape(Cout, 1).astype(jnp.float32)
    b = beta.reshape(Cout, 1).astype(jnp.float32)

    # Scheduler hint for the surrounding XLA fusions (matmul + elementwise epilogue).
    flops = 2 * (4 * Cout) * (9 * Cin) * nhw + 6 * (4 * Cout) * nhw
    bytes_accessed = 4 * (9 * Cin * nhw + 4 * Cout * 9 * Cin + 2 * Cout + 4 * Cout * nhw)
    cost = pl.CostEstimate(flops=flops, transcendentals=Cout, bytes_accessed=bytes_accessed)

    out = pl.pallas_call(
        partial(_upsample2x_kernel, eps=eps, cout=Cout, total=float(N * 4 * H * W)),
        out_shape=jax.ShapeDtypeStruct((4 * Cout, nhw), jnp.float32),
        in_specs=[pl.BlockSpec(memory_space=pltpu.MemorySpace.VMEM)] * 4,
        out_specs=pl.BlockSpec(memory_space=pltpu.MemorySpace.VMEM),
        cost_estimate=cost,
    )(xcol, wmat, g, b)
    # TODO(synk): at production shapes, add a parallel grid axis over N*H*W (megacore on
    # v7x) with an 'arbitrary' finalize step for the batch statistics and re-derive VMEM
    # tile sizes (v7x has 64 MiB physical VMEM); at this toy size a single invocation wins.

    # out[(ph*2+pw)*Cout + c, n*H*W + h*W + w] -> y[n, c, 2h+ph, 2w+pw]
    y6 = out.reshape(2, 2, Cout, N, H, W)
    return jnp.transpose(y6, (3, 2, 4, 0, 5, 1)).reshape(N, Cout, 2 * H, 2 * W)


def _reference(x, weight, gamma, beta, eps=1e-5):
    """Pure-JAX reference of the PyTorch forward (ConvT -> ReLU -> BN, training stats)."""
    wf = jnp.transpose(jnp.flip(weight, (2, 3)), (1, 0, 2, 3))   # (Cout, Cin, 4, 4)
    y = lax.conv_general_dilated(
        x, wf, window_strides=(1, 1), padding=((2, 2), (2, 2)),
        lhs_dilation=(2, 2), rhs_dilation=(1, 1),
        dimension_numbers=("NCHW", "OIHW", "NCHW"))
    y = jnp.maximum(y, 0.0)
    mean = y.mean(axis=(0, 2, 3), keepdims=True)
    var = ((y - mean) ** 2).mean(axis=(0, 2, 3), keepdims=True)
    return (gamma[None, :, None, None] * (y - mean) * lax.rsqrt(var + eps)
            + beta[None, :, None, None])


if __name__ == "__main__":
    key = jax.random.PRNGKey(0)
    kx, kw = jax.random.split(key)

    N, Cin, Cout, H, W = 2, 4, 8, 16, 16
    x = jax.random.normal(kx, (N, Cin, H, W), dtype=jnp.float32)
    # ConvTranspose2d weight shape: (in_planes, out_planes, k, k), bias=False
    weight = 0.1 * jax.random.normal(kw, (Cin, Cout, 4, 4), dtype=jnp.float32)
    gamma = jnp.ones((Cout,), jnp.float32)     # nn.BatchNorm2d init
    beta = jnp.zeros((Cout,), jnp.float32)

    fn = jax.jit(upsample_2x_pallas)
    out = jax.block_until_ready(fn(x, weight, gamma, beta))

    ref = _reference(x, weight, gamma, beta)
    assert out.shape == (N, Cout, 2 * H, 2 * W), out.shape
    assert jnp.allclose(out, ref, atol=1e-4, rtol=1e-4), float(jnp.max(jnp.abs(out - ref)))

    print("KERNEL_OK")
</pallas_src>

<mosaic_0001>
module attributes {stable_mosaic.version = 11 : i64} {
  func.func @_upsample2x_kernel(%arg0: memref<36x512xf32, #tpu.memory_space<vmem>>, %arg1: memref<32x36xf32, #tpu.memory_space<vmem>>, %arg2: memref<8x1xf32, #tpu.memory_space<vmem>>, %arg3: memref<8x1xf32, #tpu.memory_space<vmem>>, %arg4: memref<32x512xf32, #tpu.memory_space<vmem>>) attributes {dimension_semantics = [], scalar_prefetch = 0 : i64, scratch_operands = 0 : i64, tpu.core_type = #tpu.core_type<tc>} {
    %c0 = arith.constant 0 : index
    %c0_0 = arith.constant 0 : index
    %0 = vector.load %arg1[%c0, %c0_0] : memref<32x36xf32, #tpu.memory_space<vmem>>, vector<32x36xf32>
    %c0_1 = arith.constant 0 : index
    %c0_2 = arith.constant 0 : index
    %1 = vector.load %arg0[%c0_1, %c0_2] : memref<36x512xf32, #tpu.memory_space<vmem>>, vector<36x512xf32>
    %cst = arith.constant dense<0.000000e+00> : vector<32x512xf32>
    %2 = tpu.matmul %0, %1, %cst {dimension_numbers = #tpu.dot_dimension_numbers<[1], [0], [0], [1], [0, 0, 1, 1], [], []>} : vector<32x36xf32>, vector<36x512xf32>, vector<32x512xf32> -> vector<32x512xf32>
    %cst_3 = arith.constant 0.000000e+00 : f32
    %3 = vector.broadcast %cst_3 : f32 to vector<32x512xf32>
    %4 = arith.maximumf %2, %3 : vector<32x512xf32>
    %cst_4 = arith.constant dense<0.000000e+00> : vector<32xf32>
    %5 = vector.multi_reduction <add>, %4, %cst_4 [1] : vector<32x512xf32> to vector<32xf32>
    %6 = vector.shape_cast %5 : vector<32xf32> to vector<32x1xf32>
    %7 = arith.mulf %4, %4 : vector<32x512xf32>
    %cst_5 = arith.constant dense<0.000000e+00> : vector<32xf32>
    %8 = vector.multi_reduction <add>, %7, %cst_5 [1] : vector<32x512xf32> to vector<32xf32>
    %9 = vector.shape_cast %8 : vector<32xf32> to vector<32x1xf32>
    %10 = vector.extract_strided_slice %6 {offsets = [0, 0], sizes = [8, 1], strides = [1, 1]} : vector<32x1xf32> to vector<8x1xf32>
    %11 = vector.extract_strided_slice %6 {offsets = [8, 0], sizes = [8, 1], strides = [1, 1]} : vector<32x1xf32> to vector<8x1xf32>
    %12 = arith.addf %10, %11 : vector<8x1xf32>
    %13 = vector.extract_strided_slice %6 {offsets = [16, 0], sizes = [8, 1], strides = [1, 1]} : vector<32x1xf32> to vector<8x1xf32>
    %14 = arith.addf %12, %13 : vector<8x1xf32>
    %15 = vector.extract_strided_slice %6 {offsets = [24, 0], sizes = [8, 1], strides = [1, 1]} : vector<32x1xf32> to vector<8x1xf32>
    %16 = arith.addf %14, %15 : vector<8x1xf32>
    %17 = vector.extract_strided_slice %9 {offsets = [0, 0], sizes = [8, 1], strides = [1, 1]} : vector<32x1xf32> to vector<8x1xf32>
    %18 = vector.extract_strided_slice %9 {offsets = [8, 0], sizes = [8, 1], strides = [1, 1]} : vector<32x1xf32> to vector<8x1xf32>
    %19 = arith.addf %17, %18 : vector<8x1xf32>
    %20 = vector.extract_strided_slice %9 {offsets = [16, 0], sizes = [8, 1], strides = [1, 1]} : vector<32x1xf32> to vector<8x1xf32>
    %21 = arith.addf %19, %20 : vector<8x1xf32>
    %22 = vector.extract_strided_slice %9 {offsets = [24, 0], sizes = [8, 1], strides = [1, 1]} : vector<32x1xf32> to vector<8x1xf32>
    %23 = arith.addf %21, %22 : vector<8x1xf32>
    %cst_6 = arith.constant 4.8828125E-4 : f32
    %24 = vector.broadcast %cst_6 : f32 to vector<8x1xf32>
    %25 = arith.mulf %16, %24 : vector<8x1xf32>
    %cst_7 = arith.constant 4.8828125E-4 : f32
    %26 = vector.broadcast %cst_7 : f32 to vector<8x1xf32>
    %27 = arith.mulf %23, %26 : vector<8x1xf32>
    %28 = arith.mulf %25, %25 : vector<8x1xf32>
    %29 = arith.subf %27, %28 : vector<8x1xf32>
    %cst_8 = arith.constant 0.000000e+00 : f32
    %30 = vector.broadcast %cst_8 : f32 to vector<8x1xf32>
    %31 = arith.maximumf %29, %30 : vector<8x1xf32>
    %cst_9 = arith.constant 9.99999974E-6 : f32
    %32 = vector.broadcast %cst_9 : f32 to vector<8x1xf32>
    %33 = arith.addf %31, %32 : vector<8x1xf32>
    %34 = math.rsqrt %33 : vector<8x1xf32>
    %c0_10 = arith.constant 0 : index
    %c0_11 = arith.constant 0 : index
    %35 = vector.load %arg2[%c0_10, %c0_11] : memref<8x1xf32, #tpu.memory_space<vmem>>, vector<8x1xf32>
    %36 = arith.mulf %35, %34 : vector<8x1xf32>
    %c0_12 = arith.constant 0 : index
    %c0_13 = arith.constant 0 : index
    %37 = vector.load %arg3[%c0_12, %c0_13] : memref<8x1xf32, #tpu.memory_space<vmem>>, vector<8x1xf32>
    %38 = arith.mulf %25, %36 : vector<8x1xf32>
    %39 = arith.subf %37, %38 : vector<8x1xf32>
    %40 = tpu.concatenate %36, %36, %36, %36 in 0 : vector<8x1xf32>, vector<8x1xf32>, vector<8x1xf32>, vector<8x1xf32> -> vector<32x1xf32>
    %41 = tpu.concatenate %39, %39, %39, %39 in 0 : vector<8x1xf32>, vector<8x1xf32>, vector<8x1xf32>, vector<8x1xf32> -> vector<32x1xf32>
    %42 = vector.broadcast %40 : vector<32x1xf32> to vector<32x512xf32>
    %43 = arith.mulf %4, %42 : vector<32x512xf32>
    %44 = vector.broadcast %41 : vector<32x1xf32> to vector<32x512xf32>
    %45 = arith.addf %43, %44 : vector<32x512xf32>
    %c0_14 = arith.constant 0 : index
    %c0_15 = arith.constant 0 : index
    %46 = vector.load %arg4[%c0_14, %c0_15] : memref<32x512xf32, #tpu.memory_space<vmem>>, vector<32x512xf32>
    tpu.vector_store %arg4[%c0_14, %c0_15], %45 {strides = array<i32>} : memref<32x512xf32, #tpu.memory_space<vmem>>, vector<32x512xf32>,
    return
  }
}

</mosaic_0001>

<bundles_post_ra>
// kernel: upsample_2x_pallas.1
= control target key start
LH: loop header
LB: loop body
LE: loop exit
PB: predicated region body
PF: predicated region fallthrough
CT: control target
= control target key end

     0   :  { %vm54_vm0 = vcmask 1043456   ;;  %vm41_vm1 = vcmask 293888   ;;  %s633_s0 = inlined_call_operand.vmem [shape: f32[36,512], index: 0, kind: input, shape index: {}]   ;;  %s634_s1 = inlined_call_operand.vmem [shape: f32[32,36], index: 1, kind: input, shape index: {}]   ;;  %s635_s2 = inlined_call_operand.vmem [shape: f32[8,1], index: 2, kind: input, shape index: {}]   ;;  %s636_s3 = inlined_call_operand.vmem [shape: f32[8,1], index: 3, kind: input, shape index: {}]   ;;  %s637_s4 = inlined_call_operand.vmem [shape: f32[32,512], index: 4, kind: output, shape index: {}]  }
   0x1   :  { %v39_v0 = vld [vmem:[%s633_s0 + $0x90] sm:$0xf]  ;;  %v40_v2 = vld [vmem:[%s633_s0 + $0x98] sm:$0xf]  ;;  %v37_v3 = vld [vmem:[%s633_s0 + $0x80] sm:$0xf] }
   0x2   :  { %v35_v1 = vld [vmem:[%s633_s0 + $0x70] sm:$0xff]  ;;  %354 = vmatpush.msk.msra.mxu2 %vm54_vm0, %v39_v0  ;;  %359 = vmatpush.msk.msra.mxu3 %vm54_vm0, %v40_v2  ;;  %v38_v4 = vld [vmem:[%s633_s0 + $0x88] sm:$0xf]  ;;  %v36_v6 = vld [vmem:[%s633_s0 + $0x78] sm:$0xff] }
   0x3   :  { %v31_v5 = vld [vmem:[%s633_s0 + $0x50] sm:$0xff]  ;;  %344 = vmatpush.msk.msra.mxu0 %vm54_vm0, %v37_v3  ;;  %349 = vmatpush.msk.msra.mxu1 %vm54_vm0, %v38_v4  ;;  %v33_v7 = vld [vmem:[%s633_s0 + $0x60] sm:$0xff]  ;;  %v34_v8 = vld [vmem:[%s633_s0 + $0x68] sm:$0xff] }
   0x4   :  { %137 = vmatpush.msra.mxu2 %v35_v1  ;;  %166 = vmatpush.msra.mxu3 %v36_v6  ;;  %v32_v9 = vld [vmem:[%s633_s0 + $0x58] sm:$0xff]  ;;  %v29_v10 = vld [vmem:[%s633_s0 + $0x40] sm:$0xff]  ;;  %v27_v11 = vld [vmem:[%s633_s0 + $0x30] sm:$0xff] }
   0x5   :  { %79 = vmatpush.msra.mxu0 %v33_v7  ;;  %108 = vmatpush.msra.mxu1 %v34_v8  ;;  %v30_v12 = vld [vmem:[%s633_s0 + $0x48] sm:$0xff]  ;;  %v28_v13 = vld [vmem:[%s633_s0 + $0x38] sm:$0xff]  ;;  %v25_v14 = vld [vmem:[%s633_s0 + $0x20] sm:$0xff] }
   0x6   :  { %138 = vmatpush.msra.mxu2 %v31_v5  ;;  %167 = vmatpush.msra.mxu3 %v32_v9  ;;  %v26_v15 = vld [vmem:[%s633_s0 + $0x28] sm:$0xff]  ;;  %v23_v16 = vld [vmem:[%s633_s0 + $0x10] sm:$0xff]  ;;  %v24_v17 = vld [vmem:[%s633_s0 + $0x18] sm:$0xff] }
   0x7   :  { %80 = vmatpush.msra.mxu0 %v29_v10  ;;  %109 = vmatpush.msra.mxu1 %v30_v12  ;;  %v17_v18 = vld [vmem:[%s634_s1] sm:$0xff]  ;;  %v22_v20 = vld [vmem:[%s633_s0 + $0x8] sm:$0xff]  ;;  %v19_v22 = vld [vmem:[%s634_s1 + $0x10] sm:$0xff] }
   0x8   :  { %139 = vmatpush.msra.mxu2 %v27_v11  ;;  %168 = vmatpush.msra.mxu3 %v28_v13  ;;  %v21_v19 = vld [vmem:[%s633_s0] sm:$0xff]  ;;  %v18_v21 = vld [vmem:[%s634_s1 + $0x8] sm:$0xff]  ;;  %v20_v23 = vld [vmem:[%s634_s1 + $0x18] sm:$0xff] }
   0x9   :  { %81 = vmatpush.msra.mxu0 %v25_v14  ;;  %110 = vmatpush.msra.mxu1 %v26_v15 }
   0xa   :  { %140 = vmatpush.msra.mxu2 %v23_v16  ;;  %169 = vmatpush.msra.mxu3 %v24_v17 }
   0xb   :  { %355 = vmatmul.msk.f32.vlgmr.msra.gmra.mxu2 %vm41_vm1, %v17_v18  ;;  %360 = vmatmul.msk.f32.vlgmr.msra.gmra.mxu3 %vm41_vm1, %v17_v18 }
   0xc   :  { %82 = vmatpush.msra.mxu0 %v21_v19  ;;  %111 = vmatpush.msra.mxu1 %v22_v20 }
   0xd   :  { %345 = vmatmul.msk.f32.vlgmr.msra.gmra.mxu0 %vm41_vm1, %v17_v18  ;;  %350 = vmatmul.msk.f32.vlgmr.msra.gmra.mxu1 %vm41_vm1, %v17_v18 }
  0x13   :  { %356 = vmatmul.msk.f32.gmra.mxu2 %vm41_vm1, %v18_v21  ;;  %361 = vmatmul.msk.f32.gmra.mxu3 %vm41_vm1, %v18_v21 }
  0x15   :  { %346 = vmatmul.msk.f32.gmra.mxu0 %vm41_vm1, %v18_v21  ;;  %351 = vmatmul.msk.f32.gmra.mxu1 %vm41_vm1, %v18_v21 }
  0x1b   :  { %357 = vmatmul.msk.f32.gmra.mxu2 %vm41_vm1, %v19_v22  ;;  %362 = vmatmul.msk.f32.gmra.mxu3 %vm41_vm1, %v19_v22 }
  0x1d   :  { %347 = vmatmul.msk.f32.gmra.mxu0 %vm41_vm1, %v19_v22  ;;  %352 = vmatmul.msk.f32.gmra.mxu1 %vm41_vm1, %v19_v22 }
  0x23   :  { %358 = vmatmul.msk.f32.gmra.mxu2 %vm41_vm1, %v20_v23  ;;  %363 = vmatmul.msk.f32.gmra.mxu3 %vm41_vm1, %v20_v23 }
  0x25   :  { %348 = vmatmul.msk.f32.gmra.mxu0 %vm41_vm1, %v20_v23  ;;  %353 = vmatmul.msk.f32.gmra.mxu1 %vm41_vm1, %v20_v23 }
  0x8a   :  { %v84_v24 = vpop.f32.mrf.mxu0  ;;  %v113_v25 = vpop.f32.mrf.mxu1 }
  0x8b   :  { %v483_v26 = vmax.f32 %v84_v24, 0.0  ;;  %v485_v27 = vmax.f32 %v113_v25, 0.0 }
  0x8d   :  { %v219_v28 = vmul.f32 %v483_v26, %v483_v26  ;;  %v220_v29 = vmul.f32 %v485_v27, %v485_v27  ;;  %v199_v30 = vadd.f32 %v485_v27, %v483_v26 }
  0x8e   :  { %v142_v31 = vpop.f32.mrf.mxu2  ;;  %v171_v32 = vpop.f32.mrf.mxu3 }
  0x8f   :  { %v493_v33 = vmax.f32 %v142_v31, 0.0  ;;  %v495_v34 = vmax.f32 %v171_v32, 0.0  ;;  %v235_v35 = vadd.f32 %v220_v29, %v219_v28 }
  0x91   :  { %v200_v36 = vadd.f32 %v199_v30, %v493_v33  ;;  %v221_v37 = vmul.f32 %v493_v33, %v493_v33  ;;  %v222_v38 = vmul.f32 %v495_v34, %v495_v34 }
  0x92   :  { %v87_v39 = vpop.f32.mrf.mxu0  ;;  %v116_v40 = vpop.f32.mrf.mxu1 }
  0x93   :  { %v502_v41 = vmax.f32 %v87_v39, 0.0  ;;  %v504_v42 = vmax.f32 %v116_v40, 0.0  ;;  %v201_v43 = vadd.f32 %v200_v36, %v495_v34  ;;  %v236_v44 = vadd.f32 %v235_v35, %v221_v37 }
  0x94   :  { %v369_v40 = vmov 0  }
  0x95   :  { %v223_v45 = vmul.f32 %v502_v41, %v502_v41  ;;  %v204_v46 = vadd.f32 %v504_v42, %v502_v41  ;;  %v224_v47 = vmul.f32 %v504_v42, %v504_v42  ;;  %202 = vadd.xlane.f32.xlu0 %v201_v43  ;;  %v237_v48 = vadd.f32 %v236_v44, %v222_v38 }
  0x96   :  { %v145_v49 = vpop.f32.mrf.mxu2  ;;  %v174_v50 = vpop.f32.mrf.mxu3  ;;  %365 = vset.pattern.permute.xlu2 %v369_v40  ;;  %366 = vset.pattern.permute.xlu0 %v369_v40 }
  0x97   :  { %v513_v51 = vmax.f32 %v145_v49, 0.0  ;;  %238 = vadd.xlane.f32.xlu1 %v237_v48  ;;  %v515_v52 = vmax.f32 %v174_v50, 0.0  ;;  %v240_v53 = vadd.f32 %v224_v47, %v223_v45 }
  0x99   :  { %v205_v54 = vadd.f32 %v204_v46, %v513_v51  ;;  %v225_v55 = vmul.f32 %v513_v51, %v513_v51  ;;  %v226_v56 = vmul.f32 %v515_v52, %v515_v52 }
  0x9a   :  { %v90_v57 = vpop.f32.mrf.mxu0  ;;  %v119_v58 = vpop.f32.mrf.mxu1 }
  0x9b   :  { %v522_v59 = vmax.f32 %v90_v57, 0.0  ;;  %v524_v60 = vmax.f32 %v119_v58, 0.0  ;;  %v206_v61 = vadd.f32 %v205_v54, %v515_v52  ;;  %v241_v62 = vadd.f32 %v240_v53, %v225_v55 }
  0x9d   :  { %v227_v63 = vmul.f32 %v522_v59, %v522_v59  ;;  %v209_v0 = vadd.f32 %v524_v60, %v522_v59  ;;  %v228_v1 = vmul.f32 %v524_v60, %v524_v60  ;;  %207 = vadd.xlane.f32.xlu0 %v206_v61  ;;  %v242_v2 = vadd.f32 %v241_v62, %v226_v56 }
  0x9e   :  { %v148_v3 = vpop.f32.mrf.mxu2  ;;  %v177_v4 = vpop.f32.mrf.mxu3 }
  0x9f   :  { %v533_v5 = vmax.f32 %v148_v3, 0.0  ;;  %243 = vadd.xlane.f32.xlu2 %v242_v2  ;;  %v535_v6 = vmax.f32 %v177_v4, 0.0  ;;  %v245_v7 = vadd.f32 %v228_v1, %v227_v63 }
  0xa1   :  { %v229_v8 = vmul.f32 %v533_v5, %v533_v5  ;;  %v210_v9 = vadd.f32 %v209_v0, %v533_v5  ;;  %v230_v10 = vmul.f32 %v535_v6, %v535_v6 }
  0xa2   :  { %v93_v11 = vpop.f32.mrf.mxu0  ;;  %v122_v12 = vpop.f32.mrf.mxu1 }
  0xa3   :  { %v542_v13 = vmax.f32 %v93_v11, 0.0  ;;  %v544_v14 = vmax.f32 %v122_v12, 0.0  ;;  %v211_v15 = vadd.f32 %v210_v9, %v535_v6  ;;  %v246_v16 = vadd.f32 %v245_v7, %v229_v8  ;;  %v277_v7 = vld [vmem:[%s635_s2] sm:$0xff] }
  0xa5   :  { %v231_v17 = vmul.f32 %v542_v13, %v542_v13  ;;  %v214_v18 = vadd.f32 %v544_v14, %v542_v13  ;;  %v232_v19 = vmul.f32 %v544_v14, %v544_v14  ;;  %212 = vadd.xlane.f32.xlu1 %v211_v15  ;;  %v247_v20 = vadd.f32 %v246_v16, %v230_v10  ;;  %v279_v10 = vld [vmem:[%s636_s3] sm:$0xff] }
  0xa6   :  { %v151_v21 = vpop.f32.mrf.mxu2  ;;  %v180_v22 = vpop.f32.mrf.mxu3 }
  0xa7   :  { %v553_v23 = vmax.f32 %v151_v21, 0.0  ;;  %248 = vadd.xlane.f32.xlu0 %v247_v20  ;;  %v555_v24 = vmax.f32 %v180_v22, 0.0  ;;  %v250_v25 = vadd.f32 %v232_v19, %v231_v17 }
  0xa9   :  { %v233_v28 = vmul.f32 %v553_v23, %v553_v23  ;;  %v215_v29 = vadd.f32 %v214_v18, %v553_v23  ;;  %v234_v30 = vmul.f32 %v555_v24, %v555_v24 }
  0xab   :  { %v216_v31 = vadd.f32 %v215_v29, %v555_v24  ;;  %v251_v32 = vadd.f32 %v250_v25, %v233_v28 }
  0xad   :  { %217 = vadd.xlane.f32.xlu2 %v216_v31  ;;  %v252_v35 = vadd.f32 %v251_v32, %v234_v30 }
  0xaf   :  { %253 = vadd.xlane.f32.xlu1 %v252_v35 }
 0x108   :  { %v203_v36 = vpop.xlane.xlu0 %202 }
 0x10a   :  { %v239_v37 = vpop.xlane.xlu1 %238 }
 0x110   :  { %v208_v38 = vpop.xlane.xlu0 %207 }
 0x111   :  { %v255_v44 = vadd.f32 %v208_v38, %v203_v36 }
 0x112   :  { %v244_v39 = vpop.xlane.xlu2 %243 }
 0x113   :  { %v258_v46 = vadd.f32 %v244_v39, %v239_v37 }
 0x118   :  { %v213_v43 = vpop.xlane.xlu1 %212 }
 0x119   :  { %v256_v47 = vadd.f32 %v255_v44, %v213_v43 }
 0x11a   :  { %v249_v45 = vpop.xlane.xlu0 %248 }
 0x11b   :  { %v259_v49 = vadd.f32 %v258_v46, %v249_v45 }
 0x120   :  { %v218_v48 = vpop.xlane.xlu2 %217 }
 0x121   :  { %v257_v50 = vadd.f32 %v256_v47, %v218_v48 }
 0x122   :  { %v254_v53 = vpop.xlane.xlu1 %253 }
 0x123   :  { %v261_v54 = vmul.f32 0.00048828125, %v257_v50  ;;  %v260_v55 = vadd.f32 %v259_v49, %v254_v53 }
 0x125   :  { %v263_v56 = vmul.f32 %v261_v54, %v261_v54  ;;  %v262_v57 = vmul.f32 0.00048828125, %v260_v55 }
 0x127   :  { %v264_v58 = vsub.f32 %v262_v57, %v263_v56 }
 0x129   :  { %v265_v61 = vmax.f32 %v264_v58, 0.0 }
 0x12b   :  { %v266_v62 = vadd.f32 1e-05, %v265_v61 }
 0x12d   :  { %367 = vrsqrt.f32 %v266_v62  ;;  %vm273_vm3 = vweird.f32 %v266_v62 }
 0x133   :  { %v368_v63 = vpop.eup %367 }
 0x134   :  { %v268_v0 = vmul.f32 %v368_v63, %v266_v62  ;;  %vm274_vm2 = vweird.f32 %v368_v63 }
 0x135   :  { %vm275_vm4 = vmor %vm273_vm3, %vm274_vm2 }
 0x136   :  { %v269_v1 = vmul.f32 %v368_v63, %v268_v0 }
 0x138   :  { %v270_v2 = vmul.f32 0.5, %v269_v1 }
 0x13a   :  { %v271_v3 = vsub.f32 1.5, %v270_v2 }
 0x13c   :  { %v272_v4 = vmul.f32 %v368_v63, %v271_v3 }
 0x13e   :  { %v276_v8 = vsel %vm275_vm4, %v368_v63, %v272_v4 }
 0x13f   :  { %v278_v9 = vmul.f32 %v277_v7, %v276_v8 }
 0x141   :  { %284 = vperm.xlu2 %365, %v278_v9   ;;  %v280_v11 = vmul.f32 %v278_v9, %v261_v54 }
 0x143   :  { %v281_v12 = vsub.f32 %v279_v10, %v280_v11 }
 0x145   :  { %305 = vperm.xlu0 %366, %v281_v12  }
 0x19b   :  { %v285_v15 = vpop.permute.xlu2 %284 }
 0x19c   :  { %v287_v16 = vmul.f32 %v285_v15, %v483_v26  ;;  %v288_v17 = vmul.f32 %v285_v15, %v485_v27  ;;  %v289_v18 = vmul.f32 %v285_v15, %v493_v33  ;;  %v290_v19 = vmul.f32 %v285_v15, %v495_v34 }
 0x19d   :  { %v291_v21 = vmul.f32 %v285_v15, %v502_v41  ;;  %v292_v29 = vmul.f32 %v285_v15, %v504_v42  ;;  %v293_v31 = vmul.f32 %v285_v15, %v513_v51  ;;  %v294_v26 = vmul.f32 %v285_v15, %v515_v52 }
 0x19e   :  { %v295_v33 = vmul.f32 %v285_v15, %v522_v59  ;;  %v296_v41 = vmul.f32 %v285_v15, %v524_v60  ;;  %v297_v51 = vmul.f32 %v285_v15, %v533_v5  ;;  %v298_v59 = vmul.f32 %v285_v15, %v535_v6 }
 0x19f   :  { %v299_v60 = vmul.f32 %v285_v15, %v542_v13  ;;  %v300_v5 = vmul.f32 %v285_v15, %v544_v14  ;;  %v301_v6 = vmul.f32 %v285_v15, %v553_v23  ;;  %v302_v13 = vmul.f32 %v285_v15, %v555_v24 }
 0x1b7   :  { %v306_v20 = vpop.permute.xlu0 %305 }
 0x1b8   :  { %v308_v22 = vadd.f32 %v306_v20, %v287_v16  ;;  %v309_v25 = vadd.f32 %v306_v20, %v288_v17  ;;  %v310_v28 = vadd.f32 %v306_v20, %v289_v18  ;;  %v311_v30 = vadd.f32 %v306_v20, %v290_v19 }
 0x1b9   :  { %v312_v32 = vadd.f32 %v306_v20, %v291_v21  ;;  %v313_v27 = vadd.f32 %v306_v20, %v292_v29  ;;  %v314_v34 = vadd.f32 %v306_v20, %v293_v31  ;;  %v315_v42 = vadd.f32 %v306_v20, %v294_v26 }
 0x1ba   :  { %324 = vst [vmem:[%s637_s4] sm:$0xff] %v308_v22  ;;  %v316_v52 = vadd.f32 %v306_v20, %v295_v33  ;;  %v317_v35 = vadd.f32 %v306_v20, %v296_v41  ;;  %v318_v36 = vadd.f32 %v306_v20, %v297_v51  ;;  %v319_v37 = vadd.f32 %v306_v20, %v298_v59 }
 0x1bb   :  { %325 = vst [vmem:[%s637_s4 + $0x8] sm:$0xff] %v309_v25  ;;  %v320_v38 = vadd.f32 %v306_v20, %v299_v60  ;;  %v321_v39 = vadd.f32 %v306_v20, %v300_v5  ;;  %v322_v14 = vadd.f32 %v306_v20, %v301_v6  ;;  %v323_v40 = vadd.f32 %v306_v20, %v302_v13 }
 0x1bc   :  { %326 = vst [vmem:[%s637_s4 + $0x10] sm:$0xff] %v310_v28 }
 0x1bd   :  { %327 = vst [vmem:[%s637_s4 + $0x18] sm:$0xff] %v311_v30 }
 0x1be   :  { %328 = vst [vmem:[%s637_s4 + $0x20] sm:$0xff] %v312_v32 }
 0x1bf   :  { %329 = vst [vmem:[%s637_s4 + $0x28] sm:$0xff] %v313_v27 }
 0x1c0   :  { %330 = vst [vmem:[%s637_s4 + $0x30] sm:$0xff] %v314_v34 }
 0x1c1   :  { %331 = vst [vmem:[%s637_s4 + $0x38] sm:$0xff] %v315_v42 }
 0x1c2   :  { %332 = vst [vmem:[%s637_s4 + $0x40] sm:$0xff] %v316_v52 }
 0x1c3   :  { %333 = vst [vmem:[%s637_s4 + $0x48] sm:$0xff] %v317_v35 }
 0x1c4   :  { %334 = vst [vmem:[%s637_s4 + $0x50] sm:$0xff] %v318_v36 }
 0x1c5   :  { %335 = vst [vmem:[%s637_s4 + $0x58] sm:$0xff] %v319_v37 }
 0x1c6   :  { %336 = vst [vmem:[%s637_s4 + $0x60] sm:$0xff] %v320_v38 }
 0x1c7   :  { %337 = vst [vmem:[%s637_s4 + $0x68] sm:$0xff] %v321_v39 }
 0x1c8   :  { %338 = vst [vmem:[%s637_s4 + $0x70] sm:$0xff] %v322_v14 }
 0x1c9   :  { %339 = vst [vmem:[%s637_s4 + $0x78] sm:$0xff] %v323_v40 }

</bundles_post_ra>
